<compile_context>
chip_gen: v7x
topology: tpu7x:2x2x1
jax: 0.10.0
libtpu: 0.0.40
codegen_flags: <defaults>
</compile_context>

<pallas_src>
import functools

import jax
import jax.numpy as jnp
from jax.experimental import pallas as pl
from jax.experimental.pallas import tpu as pltpu

MiB = 1024 * 1024


# ------------------------------- helpers -------------------------------------

def _cdiv(a, b):
    return (a + b - 1) // b


def _round_up(n, m):
    return _cdiv(n, m) * m


def _vmem_caps():
    """(working-set budget, physical VMEM) bytes; conservative fallback = v7x."""
    try:
        cap = int(pltpu.get_tpu_info().vmem_capacity_bytes)
        if not cap or cap < 16 * MiB:
            cap = 64 * MiB
    except Exception:
        cap = 64 * MiB                      # v7x: 64 MiB / TensorCore (worst case)
    return min(cap // 3, 48 * MiB), cap


def _vmem_limit(need_bytes, phys):
    return min(int(phys * 3 // 4), max(32 * MiB, int(need_bytes) + 8 * MiB))


def _row_tile(rows, pref):
    """Row (sublane) tile: multiple of 8, balanced so the last tile is mostly
    full, >= 2 tiles when possible (v7x has 2 TensorCores on the parallel axis)."""
    pref = max(8, min(_round_up(pref, 8), _round_up(rows, 8)))
    ntiles = max(_cdiv(rows, pref), 2 if rows >= 16 else 1)
    tm = _round_up(_cdiv(rows, ntiles), 8)
    return rows if tm >= rows else tm       # full-dim block is always legal


def _lane_tile(dim, pref):
    """Lane tile: multiple of 128 that (preferably) divides dim exactly, so no
    MXU FLOPs / DMA are wasted on padding (e.g. 384 for d_out=768)."""
    if dim <= 128:
        return dim                          # full-dim block
    limit = min(max(128, (pref // 128) * 128), (dim // 128) * 128)
    best = 0
    for t in range(128, limit + 1, 128):
        if dim % t == 0:
            best = t
    return best if best else limit          # fall back to partial tail block


# ------------------- fused LayerNorm + Linear (hot path) ---------------------

def _prenorm_linear_kernel(x_ref, g_ref, bt_ref, w_ref, b_ref, o_ref, y_ref, *, eps):
    # Grid = (row tiles i [parallel], output-column tiles j [arbitrary]).
    # j is innermost + in-order per core, so the LayerNorm of the row tile is
    # computed once (j == 0), stashed in the VMEM scratch and reused for every
    # output-column tile -> no HBM round trip of the normalized activation.
    j = pl.program_id(1)

    @pl.when(j == 0)
    def _():
        x = x_ref[...].astype(jnp.float32)
        mean = jnp.mean(x, axis=-1, keepdims=True)
        xc = x - mean
        var = jnp.mean(xc * xc, axis=-1, keepdims=True)   # biased var (torch LN)
        inv = jax.lax.rsqrt(var + eps)
        y = xc * inv * g_ref[...].astype(jnp.float32) + bt_ref[...].astype(jnp.float32)
        y_ref[...] = y.astype(y_ref.dtype)

    acc = jnp.dot(y_ref[...], w_ref[...], preferred_element_type=jnp.float32)
    o_ref[...] = (acc + b_ref[...].astype(jnp.float32)).astype(o_ref.dtype)


def prenorm_linear_pallas(x, gamma2, beta2, w, b2, *, eps=1e-5,
                          tm_pref=1024, tn_pref=512):
    """net(LayerNorm(x)) for net = Linear(d, d_out), fused in one kernel.

    gamma2/beta2: (1, d) f32.  w: (d, d_out) in the compute dtype.  b2: (1, d_out).
    No host-side padding: partial edge blocks are handled by the grid.
    """
    orig_shape = x.shape
    d = orig_shape[-1]
    d_out = w.shape[-1]
    x2 = x.reshape(-1, d)                   # metadata reshape only (no copy)
    rows = x2.shape[0]
    cdt = w.dtype                           # matmul compute dtype (bf16 by default)

    budget, phys = _vmem_caps()
    tn = _lane_tile(d_out, tn_pref)
    tm = _row_tile(rows, tm_pref)

    def need(tm_):
        return (2 * tm_ * d * x.dtype.itemsize          # x blocks (double-buffered)
                + tm_ * d * cdt.itemsize                 # normalized-row scratch
                + 2 * d * tn * cdt.itemsize              # W column blocks
                + 2 * tn * b2.dtype.itemsize             # bias blocks
                + 2 * tm_ * tn * x.dtype.itemsize        # output blocks
                + 4 * d * 4)                             # gamma / beta (resident)

    while tm > 16 and need(tm) > budget:
        tm = _round_up(_cdiv(tm, 2), 8)

    grid = (_cdiv(rows, tm), _cdiv(d_out, tn))
    ni = grid[0]

    cost = pl.CostEstimate(
        flops=2 * rows * d * d_out,
        transcendentals=rows,                            # one rsqrt per row
        bytes_accessed=int(rows * d * x.dtype.itemsize             # x once
                           + ni * d * d_out * cdt.itemsize         # W per row tile
                           + rows * d_out * x.dtype.itemsize),     # output once
    )

    out = pl.pallas_call(
        functools.partial(_prenorm_linear_kernel, eps=eps),
        out_shape=jax.ShapeDtypeStruct((rows, d_out), x.dtype),
        grid_spec=pltpu.PrefetchScalarGridSpec(
            num_scalar_prefetch=0,
            grid=grid,
            in_specs=[
                pl.BlockSpec((tm, d), lambda i, j: (i, 0)),     # x row tile (full D)
                pl.BlockSpec((1, d), lambda i, j: (0, 0)),      # gamma (resident)
                pl.BlockSpec((1, d), lambda i, j: (0, 0)),      # beta  (resident)
                pl.BlockSpec((d, tn), lambda i, j: (0, j)),     # W column tile
                pl.BlockSpec((1, tn), lambda i, j: (0, j)),     # bias tile
            ],
            out_specs=pl.BlockSpec((tm, tn), lambda i, j: (i, j)),
            scratch_shapes=[pltpu.VMEM((tm, d), cdt)],          # normalized row tile
        ),
        compiler_params=pltpu.CompilerParams(
            dimension_semantics=("parallel", "arbitrary"),
            vmem_limit_bytes=_vmem_limit(need(tm), phys),
        ),
        cost_estimate=cost,
    )(x2, gamma2, beta2, w, b2)

    return out.reshape(orig_shape[:-1] + (d_out,))


# ----------------- standalone LayerNorm (generic-net fallback) ---------------

def _layernorm_kernel(x_ref, g_ref, bt_ref, o_ref, *, eps):
    x = x_ref[...].astype(jnp.float32)
    mean = jnp.mean(x, axis=-1, keepdims=True)
    xc = x - mean
    var = jnp.mean(xc * xc, axis=-1, keepdims=True)
    y = xc * jax.lax.rsqrt(var + eps) * g_ref[...].astype(jnp.float32) \
        + bt_ref[...].astype(jnp.float32)
    o_ref[...] = y.astype(o_ref.dtype)


def layernorm_pallas(x, gamma2, beta2, *, eps=1e-5, tm_pref=1024):
    orig_shape = x.shape
    d = orig_shape[-1]
    x2 = x.reshape(-1, d)
    rows = x2.shape[0]

    budget, phys = _vmem_caps()
    tm = _row_tile(rows, tm_pref)

    def need(tm_):
        return 4 * tm_ * d * x.dtype.itemsize + 4 * d * 4

    while tm > 16 and need(tm) > budget:
        tm = _round_up(_cdiv(tm, 2), 8)

    out = pl.pallas_call(
        functools.partial(_layernorm_kernel, eps=eps),
        out_shape=jax.ShapeDtypeStruct((rows, d), x.dtype),
        grid_spec=pltpu.PrefetchScalarGridSpec(
            num_scalar_prefetch=0,
            grid=(_cdiv(rows, tm),),
            in_specs=[
                pl.BlockSpec((tm, d), lambda i: (i, 0)),
                pl.BlockSpec((1, d), lambda i: (0, 0)),
                pl.BlockSpec((1, d), lambda i: (0, 0)),
            ],
            out_specs=pl.BlockSpec((tm, d), lambda i: (i, 0)),
        ),
        compiler_params=pltpu.CompilerParams(
            dimension_semantics=("parallel",),
            vmem_limit_bytes=_vmem_limit(need(tm), phys),
        ),
    )(x2, gamma2, beta2)
    return out[:rows].reshape(orig_shape)


# -------------------- tiled Linear (y = x @ W + b), fallback -----------------

def _linear_kernel(x_ref, w_ref, b_ref, o_ref, acc_ref):
    k = pl.program_id(2)

    @pl.when(k == 0)
    def _():
        acc_ref[...] = jnp.zeros_like(acc_ref)

    acc_ref[...] += jnp.dot(x_ref[...].astype(w_ref.dtype), w_ref[...],
                            preferred_element_type=jnp.float32)

    @pl.when(k == pl.num_programs(2) - 1)
    def _():
        o_ref[...] = (acc_ref[...] + b_ref[...].astype(jnp.float32)).astype(o_ref.dtype)


def linear_pallas(x, w, b2, *, tm_pref=1024, tn_pref=512, tk_pref=512):
    orig_shape = x.shape
    d_in = orig_shape[-1]
    d_out = w.shape[-1]
    x2 = x.reshape(-1, d_in)
    rows = x2.shape[0]
    cdt = w.dtype

    budget, phys = _vmem_caps()
    tn = _lane_tile(d_out, tn_pref)
    # K must be tiled exactly (OOB garbage in K would pollute valid outputs via
    # the accumulator); if d_in is not 128-aligned, use a single full-K block.
    tk = _lane_tile(d_in, tk_pref) if d_in % 128 == 0 else d_in
    tm = _row_tile(rows, tm_pref)

    def need(tm_):
        return (2 * tm_ * tk * x.dtype.itemsize
                + 2 * tk * tn * cdt.itemsize
                + 2 * tn * b2.dtype.itemsize
                + 2 * tm_ * tn * x.dtype.itemsize
                + tm_ * tn * 4)                           # f32 accumulator

    while tm > 16 and need(tm) > budget:
        tm = _round_up(_cdiv(tm, 2), 8)

    grid = (_cdiv(rows, tm), _cdiv(d_out, tn), _cdiv(d_in, tk))
    ni, nj, _ = grid

    out = pl.pallas_call(
        _linear_kernel,
        out_shape=jax.ShapeDtypeStruct((rows, d_out), x.dtype),
        grid_spec=pltpu.PrefetchScalarGridSpec(
            num_scalar_prefetch=0,
            grid=grid,
            in_specs=[
                pl.BlockSpec((tm, tk), lambda i, j, k: (i, k)),
                pl.BlockSpec((tk, tn), lambda i, j, k: (k, j)),
                pl.BlockSpec((1, tn), lambda i, j, k: (0, j)),
            ],
            out_specs=pl.BlockSpec((tm, tn), lambda i, j, k: (i, j)),
            scratch_shapes=[pltpu.VMEM((tm, tn), jnp.float32)],
        ),
        compiler_params=pltpu.CompilerParams(
            dimension_semantics=("parallel", "parallel", "arbitrary"),
            vmem_limit_bytes=_vmem_limit(need(tm), phys),
        ),
        cost_estimate=pl.CostEstimate(
            flops=2 * rows * d_in * d_out,
            transcendentals=0,
            bytes_accessed=int(nj * rows * d_in * x.dtype.itemsize
                               + ni * d_in * d_out * cdt.itemsize
                               + rows * d_out * x.dtype.itemsize),
        ),
    )(x2, w, b2)
    return out.reshape(orig_shape[:-1] + (d_out,))


# --------------------------------- modules -----------------------------------

class PallasLinear:
    """Linear(d_in, d_out).  W/b are cast + reshaped ONCE here (static per
    layer); bf16 compute dtype by default for MXU throughput / halved DMA."""

    def __init__(self, w, b, compute_dtype=jnp.bfloat16):
        self.d_in, self.d_out = w.shape
        self.w = jnp.asarray(w, compute_dtype)
        self.b = jnp.asarray(b, jnp.float32).reshape(1, -1)

    def __call__(self, x, **kwargs):
        return linear_pallas(x, self.w, self.b)


class PreNorm:
    """JAX/Pallas equivalent of the PyTorch PreNorm module.

    If `net` is a PallasLinear, LayerNorm is fused into the matmul kernel
    (no HBM round trip of the normalized activation).  Otherwise a tiled,
    pipelined LayerNorm kernel runs and `net` is called on its output.
    """

    def __init__(self, dim, net, eps=1e-5, block_m=1024, block_n=512):
        # nn.LayerNorm default init: weight=1, bias=0
        self.gamma = jnp.ones((1, dim), jnp.float32)
        self.beta = jnp.zeros((1, dim), jnp.float32)
        self.eps = eps
        self.block_m = block_m
        self.block_n = block_n
        self.net = net

    def __call__(self, x, **kwargs):
        if isinstance(self.net, PallasLinear) and not kwargs:
            return prenorm_linear_pallas(
                x, self.gamma, self.beta, self.net.w, self.net.b,
                eps=self.eps, tm_pref=self.block_m, tn_pref=self.block_n)
        # TODO(synk): generic `net` stays a Python callable; only Linear nets
        # get the fused LN+matmul kernel.
        y = layernorm_pallas(x, self.gamma, self.beta,
                             eps=self.eps, tm_pref=self.block_m)
        return self.net(y, **kwargs)


# ----------------------------------- main ------------------------------------

if __name__ == "__main__":
    # ViT-ish small shapes: rows = B*S = 394 (exercises partial edge row tiles,
    # no host-side padding anywhere), D = 128, D_OUT = 256.
    B, S, D, D_OUT = 2, 197, 128, 256
    key = jax.random.PRNGKey(0)
    kx, kw, kb, kg, kbt = jax.random.split(key, 5)

    x = jax.random.normal(kx, (B, S, D), jnp.float32)
    w = jax.random.normal(kw, (D, D_OUT), jnp.float32) * 0.02
    b = jax.random.normal(kb, (D_OUT,), jnp.float32) * 0.02
    gamma = 1.0 + 0.1 * jax.random.normal(kg, (D,), jnp.float32)
    beta = 0.1 * jax.random.normal(kbt, (D,), jnp.float32)

    # Pure-JAX f32 reference.
    mean = jnp.mean(x, axis=-1, keepdims=True)
    var = jnp.mean((x - mean) ** 2, axis=-1, keepdims=True)
    x_ln = (x - mean) * jax.lax.rsqrt(var + 1e-5) * gamma + beta
    ref = x_ln @ w + b

    # Fused path, f32 compute, small blocks so the (4, 2) grid + partial edge
    # tiles + j>0 scratch reuse all get exercised.
    net32 = PallasLinear(w, b, compute_dtype=jnp.float32)
    pre32 = PreNorm(D, net32, block_m=128, block_n=128)
    pre32.gamma = gamma.reshape(1, D)
    pre32.beta = beta.reshape(1, D)
    out32 = jax.block_until_ready(pre32(x))
    assert out32.shape == (B, S, D_OUT)
    assert jnp.allclose(out32, ref, atol=2e-3, rtol=2e-3), "fused f32 mismatch"

    # Fused path, default bf16 compute dtype + default (large, auto-capped) tiles.
    net16 = PallasLinear(w, b)                       # bf16 W, stored once at init
    pre16 = PreNorm(D, net16)
    pre16.gamma = gamma.reshape(1, D)
    pre16.beta = beta.reshape(1, D)
    out16 = jax.block_until_ready(pre16(x))
    assert out16.shape == (B, S, D_OUT)
    assert jnp.allclose(out16.astype(jnp.float32), ref, atol=5e-2, rtol=5e-2), \
        "fused bf16 mismatch"

    # Unfused fallback path (standalone LN kernel + tiled Linear kernel).
    y_ln = layernorm_pallas(x, pre32.gamma, pre32.beta, tm_pref=128)
    out_unfused = jax.block_until_ready(net32(y_ln))
    assert out_unfused.shape == (B, S, D_OUT)
    assert jnp.allclose(out_unfused, ref, atol=2e-3, rtol=2e-3), "unfused mismatch"

    print("KERNEL_OK")
</pallas_src>

<mosaic_0001>
module attributes {stable_mosaic.version = 11 : i64} {
  func.func @_prenorm_linear_kernel(%arg0: i32, %arg1: i32, %arg2: memref<104x128xf32, #tpu.memory_space<vmem>>, %arg3: memref<1x128xf32, #tpu.memory_space<vmem>>, %arg4: memref<1x128xf32, #tpu.memory_space<vmem>>, %arg5: memref<128x128xf32, #tpu.memory_space<vmem>>, %arg6: memref<1x128xf32, #tpu.memory_space<vmem>>, %arg7: memref<104x128xf32, #tpu.memory_space<vmem>>, %arg8: memref<104x128xf32, #tpu.memory_space<vmem>>) attributes {dimension_semantics = [#tpu.dimension_semantics<parallel>, #tpu.dimension_semantics<arbitrary>], iteration_bounds = array<i64: 4, 2>, scalar_prefetch = 0 : i64, scratch_operands = 1 : i64, tpu.core_type = #tpu.core_type<tc>, window_params = [{transform_indices = @transform_0, window_bounds = array<i64: 104, 128>}, {pipeline_mode = #tpu.pipeline_mode<synchronous>, transform_indices = @transform_1, window_bounds = array<i64: 1, 128>}, {pipeline_mode = #tpu.pipeline_mode<synchronous>, transform_indices = @transform_2, window_bounds = array<i64: 1, 128>}, {transform_indices = @transform_3, window_bounds = array<i64: 128, 128>}, {transform_indices = @transform_4, window_bounds = array<i64: 1, 128>}, {transform_indices = @transform_5, window_bounds = array<i64: 104, 128>}]} {
    %c0_i32 = arith.constant 0 : i32
    %0 = arith.cmpi eq, %arg1, %c0_i32 : i32
    %1 = arith.extui %0 : i1 to i32
    %c0_i32_0 = arith.constant 0 : i32
    %2 = arith.cmpi ne, %1, %c0_i32_0 : i32
    scf.if %2 {
      %c0_8 = arith.constant 0 : index
      %c0_9 = arith.constant 0 : index
      %10 = vector.load %arg2[%c0_8, %c0_9] : memref<104x128xf32, #tpu.memory_space<vmem>>, vector<104x128xf32>
      %cst_10 = arith.constant dense<0.000000e+00> : vector<104xf32>
      %11 = vector.multi_reduction <add>, %10, %cst_10 [1] : vector<104x128xf32> to vector<104xf32>
      %12 = vector.shape_cast %11 : vector<104xf32> to vector<104x1xf32>
      %cst_11 = arith.constant 1.280000e+02 : f32
      %13 = vector.broadcast %cst_11 : f32 to vector<104x1xf32>
      %14 = arith.divf %12, %13 : vector<104x1xf32>
      %15 = vector.broadcast %14 : vector<104x1xf32> to vector<104x128xf32>
      %16 = arith.subf %10, %15 : vector<104x128xf32>
      %17 = arith.mulf %16, %16 : vector<104x128xf32>
      %cst_12 = arith.constant dense<0.000000e+00> : vector<104xf32>
      %18 = vector.multi_reduction <add>, %17, %cst_12 [1] : vector<104x128xf32> to vector<104xf32>
      %19 = vector.shape_cast %18 : vector<104xf32> to vector<104x1xf32>
      %cst_13 = arith.constant 1.280000e+02 : f32
      %20 = vector.broadcast %cst_13 : f32 to vector<104x1xf32>
      %21 = arith.divf %19, %20 : vector<104x1xf32>
      %cst_14 = arith.constant 9.99999974E-6 : f32
      %22 = vector.broadcast %cst_14 : f32 to vector<104x1xf32>
      %23 = arith.addf %21, %22 : vector<104x1xf32>
      %24 = math.rsqrt %23 : vector<104x1xf32>
      %25 = vector.broadcast %24 : vector<104x1xf32> to vector<104x128xf32>
      %26 = arith.mulf %16, %25 : vector<104x128xf32>
      %c0_15 = arith.constant 0 : index
      %c0_16 = arith.constant 0 : index
      %27 = vector.load %arg3[%c0_15, %c0_16] : memref<1x128xf32, #tpu.memory_space<vmem>>, vector<1x128xf32>
      %28 = vector.broadcast %27 : vector<1x128xf32> to vector<104x128xf32>
      %29 = arith.mulf %26, %28 : vector<104x128xf32>
      %c0_17 = arith.constant 0 : index
      %c0_18 = arith.constant 0 : index
      %30 = vector.load %arg4[%c0_17, %c0_18] : memref<1x128xf32, #tpu.memory_space<vmem>>, vector<1x128xf32>
      %31 = vector.broadcast %30 : vector<1x128xf32> to vector<104x128xf32>
      %32 = arith.addf %29, %31 : vector<104x128xf32>
      %c0_19 = arith.constant 0 : index
      %c0_20 = arith.constant 0 : index
      %33 = vector.load %arg8[%c0_19, %c0_20] : memref<104x128xf32, #tpu.memory_space<vmem>>, vector<104x128xf32>
      tpu.vector_store %arg8[%c0_19, %c0_20], %32 {strides = array<i32>} : memref<104x128xf32, #tpu.memory_space<vmem>>, vector<104x128xf32>,
    } else {
    }
    %c0 = arith.constant 0 : index
    %c0_1 = arith.constant 0 : index
    %3 = vector.load %arg8[%c0, %c0_1] : memref<104x128xf32, #tpu.memory_space<vmem>>, vector<104x128xf32>
    %c0_2 = arith.constant 0 : index
    %c0_3 = arith.constant 0 : index
    %4 = vector.load %arg5[%c0_2, %c0_3] : memref<128x128xf32, #tpu.memory_space<vmem>>, vector<128x128xf32>
    %cst = arith.constant dense<0.000000e+00> : vector<104x128xf32>
    %5 = tpu.matmul %3, %4, %cst {dimension_numbers = #tpu.dot_dimension_numbers<[1], [0], [0], [1], [0, 0, 1, 1], [], []>} : vector<104x128xf32>, vector<128x128xf32>, vector<104x128xf32> -> vector<104x128xf32>
    %c0_4 = arith.constant 0 : index
    %c0_5 = arith.constant 0 : index
    %6 = vector.load %arg6[%c0_4, %c0_5] : memref<1x128xf32, #tpu.memory_space<vmem>>, vector<1x128xf32>
    %7 = vector.broadcast %6 : vector<1x128xf32> to vector<104x128xf32>
    %8 = arith.addf %5, %7 : vector<104x128xf32>
    %c0_6 = arith.constant 0 : index
    %c0_7 = arith.constant 0 : index
    %9 = vector.load %arg7[%c0_6, %c0_7] : memref<104x128xf32, #tpu.memory_space<vmem>>, vector<104x128xf32>
    tpu.vector_store %arg7[%c0_6, %c0_7], %8 {strides = array<i32>} : memref<104x128xf32, #tpu.memory_space<vmem>>, vector<104x128xf32>,
    return
  }
  func.func @transform_0(%arg0: i32, %arg1: i32) -> (i32, i32) {
    %c0_i32 = arith.constant 0 : i32
    %c0_i32_0 = arith.constant 0 : i32
    return %arg0, %c0_i32 : i32, i32
  }
  func.func @transform_1(%arg0: i32, %arg1: i32) -> (i32, i32) {
    %c0_i32 = arith.constant 0 : i32
    %c0_i32_0 = arith.constant 0 : i32
    %c0_i32_1 = arith.constant 0 : i32
    return %c0_i32, %c0_i32_0 : i32, i32
  }
  func.func @transform_2(%arg0: i32, %arg1: i32) -> (i32, i32) {
    %c0_i32 = arith.constant 0 : i32
    %c0_i32_0 = arith.constant 0 : i32
    %c0_i32_1 = arith.constant 0 : i32
    return %c0_i32, %c0_i32_0 : i32, i32
  }
  func.func @transform_3(%arg0: i32, %arg1: i32) -> (i32, i32) {
    %c0_i32 = arith.constant 0 : i32
    %c0_i32_0 = arith.constant 0 : i32
    return %c0_i32, %arg1 : i32, i32
  }
  func.func @transform_4(%arg0: i32, %arg1: i32) -> (i32, i32) {
    %c0_i32 = arith.constant 0 : i32
    %c0_i32_0 = arith.constant 0 : i32
    return %c0_i32, %arg1 : i32, i32
  }
  func.func @transform_5(%arg0: i32, %arg1: i32) -> (i32, i32) {
    %c0_i32 = arith.constant 0 : i32
    return %arg0, %arg1 : i32, i32
  }
}

</mosaic_0001>

<bundles_post_ra>
// kernel: tpu_custom_call.1
= control target key start
LH: loop header
LB: loop body
LE: loop exit
PB: predicated region body
PF: predicated region fallthrough
CT: control target
= control target key end

     0   :  { %s1967_s0 = inlined_call_operand.hbm [shape: f32[394,128], index: 0, kind: input, shape index: {}]   ;;  %s1968_s1 = inlined_call_operand.vmem [shape: f32[1,128], index: 1, kind: input, shape index: {}]   ;;  %s1969_s2 = inlined_call_operand.vmem [shape: f32[1,128], index: 2, kind: input, shape index: {}]   ;;  %s1970_s3 = inlined_call_operand.hbm [shape: f32[128,256], index: 3, kind: input, shape index: {}]   ;;  %s1971_s4 = inlined_call_operand.vmem [shape: f32[1,256], index: 4, kind: input, shape index: {}]   ;;  %s1972_s5 = inlined_call_operand.hbm [shape: f32[394,256], index: 5, kind: output, shape index: {}]  }
   0x1   :  { %1982 = sst [smem:[#allocation21_spill]] %s1967_s0 }
   0x2   :  { %1983 = sst [smem:[#allocation22_spill]] %s1972_s5 }
   0x3   :  { %10 = vsyncpa [#allocation4], 0 }
   0x4   :  { %12 = vsyncpa [#allocation4 + $0x1], 0 }
   0x5   :  { %13 = vsyncpa [#allocation7], 0 }
   0x6   :  { %15 = vsyncpa [#allocation7 + $0x1], 0 }
   0x7   :  { %16 = vsyncpa [#allocation5], 0 }
   0x8   :  { %18 = vsyncpa [#allocation5 + $0x1], 0  ;;  %s1439_s18 = smov 0   ;;  %s1441_s19 = smov 0  }
   0x9   :  { %s1443_s20 = smov 0   ;;  %s1445_s21 = smov 0  }
   0xa   :  { %s1447_s22 = smov 0   ;;  %s1449_s23 = smov 0  }
   0xb   :  { %s1451_s24 = smov 0   ;;  %s1453_s25 = smov 0  }
   0xc   :  { %s1455_s26 = smov 0   ;;  %s1457_s27 = smov 0  }
   0xd   :  { %s1459_s28 = smov 0   ;;  %s1461_s29 = smov 0  }
   0xe   :  { %s1463_s30 = smov 0   ;;  %s1465_s6 = smov 0  }
   0xf LB: > { %1984 = sst [smem:[#allocation12_spill]] %s1349_s20  ;;  %s1973_s7 = sadd.s32 4294967295, %s1393_s6   ;;  %s1393_s6 = sphi %s1465_s6, %s24_s6   ;;  %s1389_s30 = sphi %s1463_s30, %s2016_s30   ;;  %s1385_s29 = sphi %s1461_s29, %s2025_s29   ;;  %s1381_s28 = sphi %s1459_s28, %s2014_s28   ;;  %s1377_s27 = sphi %s1457_s27, %s2024_s27   ;;  %s1373_s26 = sphi %s1455_s26, %s2013_s26   ;;  %s1369_s25 = sphi %s1453_s25, %s2023_s25   ;;  %s1365_s24 = sphi %s1451_s24, %s2022_s24   ;;  %s1361_s23 = sphi %s1449_s23, %s2021_s23   ;;  %s1357_s22 = sphi %s1447_s22, %s2020_s22   ;;  %s1353_s21 = sphi %s1445_s21, %s2019_s21   ;;  %s1349_s20 = sphi %s1443_s20, %s2010_s20   ;;  %s1345_s19 = sphi %s1441_s19, %s2018_s19   ;;  %s1341_s18 = sphi %s1439_s18, %s2017_s18  }
  0x10   : > { %1985 = sst [smem:[#allocation13_spill]] %s1373_s26  ;;  %s33_s9 = sadd.s32 1, %s1385_s29 }
  0x11   : > { %1986 = sst [smem:[#allocation14_spill]] %s1381_s28  ;;  %s36_s10 = sadd.s32 1, %s1389_s30 }
  0x12   : > { %1987 = sst [smem:[#allocation15_spill]] %s1389_s30  ;;  %p34_p0 = scmp.ge.s32.totalorder %s33_s9, 2 }
  0x13   : > { %s43_s11 = sadd.s32 1, %s1373_s26  ;;  %p50_p1 = scmp.ne.s32.totalorder %s1373_s26, %s1369_s25 }
  0x14   : > { %p51_p2 = scmp.eq.s32.totalorder %s1393_s6, 0  ;;  %s2027_s9 = smov (%p34_p0, %s33_s9), 0 }
  0x15   : > { %1988 = sst [smem:[#allocation16_spill]] %s2027_s9  ;;  %s2029_s10 = smov (!%p34_p0, %s36_s10), %s1389_s30 }
  0x16   : > { %p1520_p3 = por %p51_p2, %p50_p1  ;;  %p56_p4 = scmp.ne.s32.totalorder %s1369_s25, %s1365_s24 }
  0x17   : > { %p38_p5 = scmp.ge.s32.totalorder %s2029_s10, 4  ;;  %p1527_p6 = scmp.eq.s32.totalorder %s1973_s7, 0 }
  0x18   : > { %s108_s14 = ssub.s32 %s1385_s29, %s2027_s9  ;;  %s111_s15 = sadd.s32 1, %s1361_s23 }
  0x19   : > { %s2031_s10 = smov (%p38_p5, %s2029_s10), 0  ;;  %p1538_p7 = por %p1527_p6, %p56_p4 }
  0x1a   : > { %1991 = sst [smem:[#allocation17_spill]] %s2031_s10  ;;  %p109_p8 = scmp.eq.s32.totalorder %s108_s14, 0 }
  0x1b   : > { %s40_s17 = ssub.s32 %s1389_s30, %s2031_s10  ;;  %p118_p9 = scmp.ne.s32.totalorder %s1361_s23, %s1357_s22 }
  0x1c   : > { %p41_p10 = scmp.eq.s32.totalorder %s40_s17, 0  ;;  %p124_p11 = scmp.ne.s32.totalorder %s1357_s22, %s1353_s21 }
  0x1d   : > { %s1549_s24 = scalar_select %p109_p8, %s1361_s23, %s111_s15  }
  0x1e   : > { %s1552_s8 = scalar_select %p41_p10, %s1373_s26, %s43_s11  }
  0x1f   : > { %1993 = sst [smem:[#allocation18_spill]] %s1549_s24  ;;  %p1556_p12 = por %p118_p9, %p51_p2 }
  0x20   : > { %1994 = sst [smem:[#allocation19_spill]] %s1552_s8  ;;  %p1562_p13 = por %p124_p11, %p1527_p6 }
  0x21   : > { %s162_s5 = sor.u32 %s108_s14, %s40_s17  ;;  %s165_s10 = sadd.s32 1, %s1349_s20 }
  0x22   : > { %s1996_s9 = scalar_select %p1562_p13, 1, 0 }
  0x23   : > { %p163_p0 = scmp.eq.s32.totalorder %s162_s5, 0  ;;  %p175_p1 = scmp.ne.s32.totalorder %s1349_s20, %s1345_s19 }
  0x24   : > { %s1997_s28 = sadd.s32 4294967295, %s1393_s6   ;;  %p181_p5 = scmp.ne.s32.totalorder %s1345_s19, %s1341_s18 }
  0x25   : > { %p176_p4 = scmp.eq.s32.totalorder %s1997_s28, 7  ;;  %s2000_s15 = sadd.s32 4294967294, %s1393_s6  }
  0x26   : > { %s1574_s21 = scalar_select %p163_p0, %s1349_s20, %s165_s10  }
  0x27   : > { %p1576_p8 = por %p176_p4, %p175_p1  ;;  %p182_p2 = scmp.eq.s32.totalorder %s2000_s15, 7 }
  0x28   : > { %1998 = sst [smem:[#allocation20_spill]] %s1574_s21  ;;  %p862_p6 = scmp.ge.s32.totalorder %s1393_s6, 8 }
  0x29   : > { %s1999_s11 = scalar_select %p1576_p8, 1, 0 }
  0x2a   : > { %p1582_p9 = por %p182_p2, %p181_p5  ;;  %204 = sbr.rel (%p862_p6) target bundleno = 116 (0x74), region = 24 }
  0x2c   : > { %s2001_s13 = scalar_select %p1582_p9, 1, 0 }
  0x31   : > { %207 = sbr.rel (!%p1520_p3) target bundleno = 89 (0x59), region = 28  ;;  %s208_s5 = sand.u32 (%p1520_p3), 1, %s1373_s26  }
  0x32   : > { %s213_s28 = smul.u32 (%p1520_p3), 13, %s1389_s30  ;;  %s1594_s8 = scalar_lea.sflag (%p1520_p3), [#allocation4], %s208_s5 }
  0x33   : > { %s1026_s10 = smul.u32 (%p1520_p3), 104, %s208_s5 }
  0x34   : > { %s214_s14 = ssub.s32 (%p1520_p3), 50, %s213_s28 }
  0x35   : > { %p215_p10 = scmp.lt.s32.totalorder (%p1520_p3), %s214_s14, 13  ;;  %s212_s24 = scalar_lea.vmem (%p1520_p3), [#allocation3], %s1026_s10 }
  0x38   : > { %s2033_s14 = smov (!%p215_p10, %s214_s14), 13 }
  0x39   : > { %s1591_s17 = sshll.u32 %s2033_s14, 7 }
  0x3a   : > { %s219_s15 = ssub.s32 1664, %s1591_s17 }
  0x3b   : > { %220 = vsyncadd %s1594_s8, %s219_s15  ;;  %p864_p3 = scmp.ne.s32.totalorder %s1591_s17, 0  ;;  %s884_s12 = smul.u32 1664, %s1389_s30 }
  0x3c   : > { %s225_s26 = sshll.u32 %s212_s24, 4  ;;  %s2002_s0 = sld [smem:[#allocation21_spill]]  ;;  %s1604_s26 = int_to_ptr.vmem [resolvable:$true] %s225_s26 }
  0x42   : > { %s1602_s20 = scalar_lea.hbm %s2002_s0, %s884_s12  ;;  %s1191_s24 = scalar_lea.hbm %s2002_s0, 6400 }
  0x43   : > { %s1187_s5 = scalar_lea.hbm %s1602_s20, %s1591_s17  ;;  %p1192_p4 = scmp.lt.u32.totalorder %s1602_s20, %s2002_s0 }
  0x44   : > { %p1188_p11 = scmp.ne.s32.totalorder %s1602_s20, %s1187_s5  ;;  %p1193_p5 = scmp.lt.u32.totalorder %s1191_s24, %s1187_s5 }
  0x45   : > { %p1195_p6 = scmp.lt.u32.totalorder %s1187_s5, %s1602_s20 }
  0x46   : > { %p1189_p0 = pnand %p1188_p11, %p864_p3  ;;  %p1194_p2 = por %p1193_p5, %p1192_p4 }
  0x48   : > { %p1190_p1 = pneg %p1189_p0  ;;  %p1196_p10 = por %p1195_p6, %p1194_p2 }
  0x4a   : > { %p1197_p9 = pnand %p1196_p10, %p1190_p1 }
  0x4c   : > { %1200 = shalt.err (!%p1197_p9)
}
  0x4d   : > { %s1201_s21 = scalar_lea.vmem %s1604_s26, %s1591_s17  ;;  %s1395_s12 = smov [#allocation3]  }
  0x4e   : > { %p1202_p11 = scmp.ne.s32.totalorder %s1604_s26, %s1201_s21  ;;  %s1205_s28 = sshll.u32 %s1395_s12, 4  ;;  %s1206_s28 = int_to_ptr.vmem [resolvable:$false] %s1205_s28 }
  0x4f   : > { %s1207_s30 = scalar_lea.vmem %s1206_s28, 3328  ;;  %p1208_p13 = scmp.lt.s32.totalorder %s1604_s26, %s1206_s28 }
  0x50   : > { %p1203_p0 = pnand %p1202_p11, %p864_p3  ;;  %p1209_p4 = scmp.lt.s32.totalorder %s1207_s30, %s1201_s21 }
  0x52   : > { %p1204_p8 = pneg %p1203_p0  ;;  %p1210_p5 = por %p1209_p4, %p1208_p13 }
  0x54   : > { %p1211_p2 = pnand %p1210_p5, %p1204_p8 }
  0x56   : > { %1214 = shalt.err (!%p1211_p2)
}
  0x57   : > { %s1396_s5 = smov 128   ;;  %s1397_s10 = smov 8  }
  0x58   : > { %231 = dma.hbm_to_vmem [thread:$0]  (%p864_p3), %s1602_s20, %s1591_s17, %s1604_s26, %s1594_s8, %s1396_s5, %s1396_s5, %s1397_s10  }
  0x59 PF: > { %s235_s14 = sand.u32 1, %s1361_s23   ;;  %s869_s24 = sshll.u32 %s1385_s29, 7 }
  0x5a   : > { %s868_s15 = sshll.u32 %s235_s14, 7  ;;  %s1636_s28 = scalar_lea.hbm %s1970_s3, %s869_s24 }
  0x5b   : > { %s239_s30 = scalar_lea.vmem [#allocation6], %s868_s15  ;;  %s1640_s20 = scalar_lea.sflag [#allocation7], %s235_s14 }
  0x5c   : > { %s245_s0 = sshll.u32 %s239_s30, 4  ;;  %s1215_s26 = scalar_lea.hbm %s1636_s28, 2048  ;;  %s1638_s0 = int_to_ptr.vmem [resolvable:$true] %s245_s0 }
  0x5d   : > { %p1216_p13 = scmp.ne.s32.totalorder %s1636_s28, %s1215_s26  ;;  %s1219_s5 = scalar_lea.hbm %s1970_s3, 4096 }
  0x5e   : > { %p1220_p3 = scmp.lt.u32.totalorder %s1636_s28, %s1970_s3  ;;  %p1221_p1 = scmp.lt.u32.totalorder %s1219_s5, %s1215_s26 }
  0x5f   : > { %p1217_p8 = pnand %p1216_p13, %p1556_p12  ;;  %p1223_p10 = scmp.lt.u32.totalorder %s1215_s26, %s1636_s28 }
  0x60   : > { %p1222_p6 = por %p1221_p1, %p1220_p3 }
  0x61   : > { %p1218_p9 = pneg %p1217_p8 }
  0x62   : > { %p1224_p11 = por %p1223_p10, %p1222_p6 }
  0x64   : > { %p1225_p0 = pnand %p1224_p11, %p1218_p9 }
  0x66   : > { %1228 = shalt.err (!%p1225_p0)
}
  0x67   : > { %s1229_s14 = scalar_lea.vmem %s1638_s0, 2048  ;;  %s1398_s15 = smov [#allocation6]  }
  0x68   : > { %p1230_p4 = scmp.ne.s32.totalorder %s1638_s0, %s1229_s14  ;;  %s1233_s21 = sshll.u32 %s1398_s15, 4  ;;  %s1234_s21 = int_to_ptr.vmem [resolvable:$false] %s1233_s21 }
  0x69   : > { %s1235_s12 = scalar_lea.vmem %s1234_s21, 4096  ;;  %p1236_p13 = scmp.lt.s32.totalorder %s1638_s0, %s1234_s21 }
  0x6a   : > { %p1231_p5 = pnand %p1230_p4, %p1556_p12  ;;  %p1237_p8 = scmp.lt.s32.totalorder %s1235_s12, %s1229_s14 }
  0x6c   : > { %p1232_p2 = pneg %p1231_p5  ;;  %p1238_p3 = por %p1237_p8, %p1236_p13 }
  0x6e   : > { %p1239_p1 = pnand %p1238_p3, %p1232_p2 }
  0x70   : > { %1242 = shalt.err (!%p1239_p1)
}
  0x71   : > { %s1399_s30 = smov 256   ;;  %s1400_s26 = smov 128  }
  0x72   : > { %s1401_s8 = smov 8  }
  0x73   : > { %1029 = dma.hbm_to_vmem [thread:$0]  (%p1556_p12), %s1636_s28, 2048, %s1638_s0, %s1640_s20, %s1399_s30, %s1400_s26, %s1401_s8  }
  0x74 PF: > { %p870_p9 = scmp.ge.s32.totalorder %s1393_s6, 1  ;;  %p259_p6 = scmp.lt.s32.totalorder %s1393_s6, 9 }
  0x76   : > { %p260_p10 = pnand %p870_p9, %p259_p6 }
  0x77   : > { %s265_s17 = sand.u32 (!%p260_p10), 1, %s1369_s25  }
  0x78   : > { %263 = sbr.rel (%p260_p10) target bundleno = 778 (0x30a), region = 40  ;;  %s266_s10 = scalar_lea.sflag (!%p260_p10), [#allocation4], %s265_s17 }
  0x79   : > { %s1027_s5 = smul.u32 (!%p260_p10), 104, %s265_s17 }
  0x7b   : > { %s1667_s24 = scalar_lea.vmem (!%p260_p10), [#allocation3], %s1027_s5 }
  0x7f   : > { %1328 = dma.done.wait (%p1538_p7), %s266_s10, 1664  }
  0x80   : > { %1330 = vsyncadd (%p1538_p7), %s266_s10, 4294965632  ;;  %s274_s0 = sand.u32 1, %s1357_s22   ;;  %p2003_p12 = scmp.ne.s32.totalorder %s1996_s9, 0 }
  0x81   : > { %s871_s7 = sshll.u32 %s274_s0, 7  ;;  %s275_s28 = scalar_lea.sflag [#allocation7], %s274_s0 }
  0x82   : > { %s1674_s20 = scalar_lea.vmem [#allocation6], %s871_s7 }
  0x83   : > { %1332 = dma.done.wait (%p2003_p12), %s275_s28, 2048  }
  0x84   : > { %1334 = vsyncadd (%p2003_p12), %s275_s28, 4294965248  ;;  %s310_s14 = sand.u32 1, %s1345_s19   ;;  %p318_p11 = scmp.lt.s32.totalorder %s1377_s27, 1 }
  0x85   : > { %s1028_s16 = smul.u32 104, %s310_s14  ;;  %p872_p7 = scmp.ne.s32.totalorder %s1377_s27, 0 }
  0x86   : > { %s1685_s15 = scalar_select %p318_p11, %s1377_s27, 1 }
  0x87   : > { %s1691_s26 = scalar_lea.vmem [#allocation8], %s1028_s16  ;;  %329 = sbr.rel (%p872_p7) target bundleno = 473 (0x1d9), region = 52  ;;  %v330_v0 = vld [vmem:[%s1667_s24] sm:$0xff] (!%p872_p7)  ;;  %v332_v1 = vld [vmem:[%s1667_s24 + $0x10] sm:$0xff] (!%p872_p7)  ;;  %v331_v2 = vld [vmem:[%s1667_s24 + $0x8] sm:$0xff] (!%p872_p7) }
  0x88   : > { %s320_s30 = scalar_lea.vmem %s1971_s4, %s1685_s15  ;;  %343 = vadd.xlane.f32.xlu0 (!%p872_p7), %v330_v0  ;;  %347 = vadd.xlane.f32.xlu1 (!%p872_p7), %v332_v1  ;;  %v333_v3 = vld [vmem:[%s1667_s24 + $0x18] sm:$0xff] (!%p872_p7)  ;;  %v334_v4 = vld [vmem:[%s1667_s24 + $0x20] sm:$0xff] (!%p872_p7)  ;;  %v335_v5 = vld [vmem:[%s1667_s24 + $0x28] sm:$0xff] (!%p872_p7) }
  0x89   : > { %v336_v6 = vld [vmem:[%s1667_s24 + $0x30] sm:$0xff] (!%p872_p7)  ;;  %v337_v7 = vld [vmem:[%s1667_s24 + $0x38] sm:$0xff] (!%p872_p7)  ;;  %v338_v8 = vld [vmem:[%s1667_s24 + $0x40] sm:$0xff] (!%p872_p7) }
  0x8a   : > { %v339_v9 = vld [vmem:[%s1667_s24 + $0x48] sm:$0xff] (!%p872_p7)  ;;  %v340_v10 = vld [vmem:[%s1667_s24 + $0x50] sm:$0xff] (!%p872_p7)  ;;  %v341_v11 = vld [vmem:[%s1667_s24 + $0x58] sm:$0xff] (!%p872_p7) }
  0x8b   : > { %v342_v12 = vld [vmem:[%s1667_s24 + $0x60] sm:$0xff] (!%p872_p7) }
  0x8c   : > { %345 = vadd.xlane.f32.xlu0 (!%p872_p7), %v331_v2  ;;  %349 = vadd.xlane.f32.xlu1 (!%p872_p7), %v333_v3 }
  0x90   : > { %351 = vadd.xlane.f32.xlu0 %v334_v4  ;;  %353 = vadd.xlane.f32.xlu1 %v335_v5 }
  0x94   : > { %355 = vadd.xlane.f32.xlu0 %v336_v6  ;;  %357 = vadd.xlane.f32.xlu1 %v337_v7 }
  0x98   : > { %359 = vadd.xlane.f32.xlu0 %v338_v8  ;;  %361 = vadd.xlane.f32.xlu1 %v339_v9 }
  0x9c   : > { %363 = vadd.xlane.f32.xlu0 %v340_v10  ;;  %365 = vadd.xlane.f32.xlu1 %v341_v11 }
  0xa0   : > { %367 = vadd.xlane.f32.xlu0 %v342_v12 }
 0x115   : > { %v344_v13 = vpop.xlane.xlu0 %343  ;;  %v348_v14 = vpop.xlane.xlu1 %347 }
 0x116   : > { %v370_v15 = vmul.f32 0.0078125, %v344_v13  ;;  %v372_v16 = vmul.f32 0.0078125, %v348_v14 }
 0x118   : > { %v1707_v17 = vsub.f32 %v330_v0, %v370_v15  ;;  %v1709_v18 = vsub.f32 %v332_v1, %v372_v16 }
 0x119   : > { %v346_v19 = vpop.xlane.xlu0 %345  ;;  %v350_v20 = vpop.xlane.xlu1 %349 }
 0x11a   : > { %v371_v21 = vmul.f32 0.0078125, %v346_v19  ;;  %v396_v22 = vmul.f32 %v1707_v17, %v1707_v17  ;;  %v373_v23 = vmul.f32 0.0078125, %v350_v20  ;;  %v398_v26 = vmul.f32 %v1709_v18, %v1709_v18 }
 0x11c   : > { %v1713_v24 = vsub.f32 %v331_v2, %v371_v21  ;;  %409 = vadd.xlane.f32.xlu1 %v396_v22  ;;  %v1715_v25 = vsub.f32 %v333_v3, %v373_v23  ;;  %v1762_v23 = vld [vmem:[%s1968_s1] ss:$0 sm:$0xff] }
 0x11d   : > { %v352_v27 = vpop.xlane.xlu0 %351  ;;  %v354_v28 = vpop.xlane.xlu1 %353 }
 0x11e   : > { %v374_v29 = vmul.f32 0.0078125, %v352_v27  ;;  %v397_v30 = vmul.f32 %v1713_v24, %v1713_v24  ;;  %v375_v31 = vmul.f32 0.0078125, %v354_v28  ;;  %v399_v34 = vmul.f32 %v1715_v25, %v1715_v25 }
 0x120   : > { %v1721_v32 = vsub.f32 %v334_v4, %v374_v29  ;;  %413 = vadd.xlane.f32.xlu1 %v398_v26  ;;  %411 = vadd.xlane.f32.xlu0 %v397_v30  ;;  %v1723_v33 = vsub.f32 %v335_v5, %v375_v31  ;;  %v1768_v31 = vld [vmem:[%s1969_s2] ss:$0 sm:$0xff] }
 0x121   : > { %v356_v35 = vpop.xlane.xlu0 %355  ;;  %v358_v36 = vpop.xlane.xlu1 %357 }
 0x122   : > { %v376_v37 = vmul.f32 0.0078125, %v356_v35  ;;  %v400_v38 = vmul.f32 %v1721_v32, %v1721_v32  ;;  %v377_v39 = vmul.f32 0.0078125, %v358_v36  ;;  %v401_v42 = vmul.f32 %v1723_v33, %v1723_v33 }
 0x124   : > { %v1729_v40 = vsub.f32 %v336_v6, %v376_v37  ;;  %415 = vadd.xlane.f32.xlu0 %v399_v34  ;;  %417 = vadd.xlane.f32.xlu1 %v400_v38  ;;  %v1731_v41 = vsub.f32 %v337_v7, %v377_v39 }
 0x125   : > { %v360_v43 = vpop.xlane.xlu0 %359  ;;  %v362_v44 = vpop.xlane.xlu1 %361 }
 0x126   : > { %v378_v45 = vmul.f32 0.0078125, %v360_v43  ;;  %v402_v46 = vmul.f32 %v1729_v40, %v1729_v40  ;;  %v379_v47 = vmul.f32 0.0078125, %v362_v44  ;;  %v403_v50 = vmul.f32 %v1731_v41, %v1731_v41 }
 0x128   : > { %v1737_v48 = vsub.f32 %v338_v8, %v378_v45  ;;  %419 = vadd.xlane.f32.xlu0 %v401_v42  ;;  %421 = vadd.xlane.f32.xlu1 %v402_v46  ;;  %v1739_v49 = vsub.f32 %v339_v9, %v379_v47 }
 0x129   : > { %v364_v51 = vpop.xlane.xlu0 %363  ;;  %v366_v52 = vpop.xlane.xlu1 %365 }
 0x12a   : > { %v380_v53 = vmul.f32 0.0078125, %v364_v51  ;;  %v404_v54 = vmul.f32 %v1737_v48, %v1737_v48  ;;  %v381_v55 = vmul.f32 0.0078125, %v366_v52  ;;  %v405_v58 = vmul.f32 %v1739_v49, %v1739_v49 }
 0x12c   : > { %v1745_v56 = vsub.f32 %v340_v10, %v380_v53  ;;  %423 = vadd.xlane.f32.xlu0 %v403_v50  ;;  %425 = vadd.xlane.f32.xlu1 %v404_v54  ;;  %v1747_v57 = vsub.f32 %v341_v11, %v381_v55 }
 0x12d   : > { %v368_v59 = vpop.xlane.xlu0 %367 }
 0x12e   : > { %v382_v60 = vmul.f32 0.0078125, %v368_v59  ;;  %v406_v61 = vmul.f32 %v1745_v56, %v1745_v56  ;;  %v407_v63 = vmul.f32 %v1747_v57, %v1747_v57 }
 0x130   : > { %v1753_v62 = vsub.f32 %v342_v12, %v382_v60  ;;  %427 = vadd.xlane.f32.xlu0 %v405_v58  ;;  %429 = vadd.xlane.f32.xlu1 %v406_v61 }
 0x132   : > { %v408_v0 = vmul.f32 %v1753_v62, %v1753_v62 }
 0x134   : > { %431 = vadd.xlane.f32.xlu0 %v407_v63  ;;  %433 = vadd.xlane.f32.xlu1 %v408_v0 }
 0x1a9   : > { %v410_v1 = vpop.xlane.xlu1 %409 }
 0x1aa   : > { %v435_v2 = vmul.f32 0.0078125, %v410_v1 }
 0x1ac   : > { %v448_v3 = vadd.f32 1e-05, %v435_v2 }
 0x1ad   : > { %v414_v4 = vpop.xlane.xlu1 %413  ;;  %v412_v5 = vpop.xlane.xlu0 %411 }
 0x1ae   : > { %1161 = vrsqrt.f32 %v448_v3  ;;  %v437_v6 = vmul.f32 0.0078125, %v414_v4  ;;  %v436_v7 = vmul.f32 0.0078125, %v412_v5 }
 0x1b0   : > { %v450_v8 = vadd.f32 1e-05, %v437_v6  ;;  %v449_v9 = vadd.f32 1e-05, %v436_v7 }
 0x1b1   : > { %v418_v10 = vpop.xlane.xlu1 %417  ;;  %v416_v11 = vpop.xlane.xlu0 %415 }
 0x1b2   : > { %1163 = vrsqrt.f32 %v450_v8  ;;  %v439_v12 = vmul.f32 0.0078125, %v418_v10  ;;  %v438_v13 = vmul.f32 0.0078125, %v416_v11 }
 0x1b3   : > { %1165 = vrsqrt.f32 %v449_v9 }
 0x1b4   : > { %v452_v14 = vadd.f32 1e-05, %v439_v12  ;;  %v451_v15 = vadd.f32 1e-05, %v438_v13 }
 0x1b5   : > { %v422_v16 = vpop.xlane.xlu1 %421  ;;  %v420_v19 = vpop.xlane.xlu0 %419 }
 0x1b6   : > { %1167 = vrsqrt.f32 %v452_v14  ;;  %v441_v20 = vmul.f32 0.0078125, %v422_v16  ;;  %v440_v21 = vmul.f32 0.0078125, %v420_v19 }
 0x1b7   : > { %1169 = vrsqrt.f32 %v451_v15 }
 0x1b8   : > { %v1162_v22 = vpop.eup %1161  ;;  %v454_v26 = vadd.f32 1e-05, %v441_v20  ;;  %v453_v27 = vadd.f32 1e-05, %v440_v21 }
 0x1b9   : > { %v474_v28 = vmul.f32 %v1162_v22, %v1707_v17  ;;  %v426_v29 = vpop.xlane.xlu1 %425  ;;  %v424_v30 = vpop.xlane.xlu0 %423 }
 0x1ba   : > { %1171 = vrsqrt.f32 %v454_v26  ;;  %v443_v34 = vmul.f32 0.0078125, %v426_v29  ;;  %v442_v35 = vmul.f32 0.0078125, %v424_v30 }
 0x1bb   : > { %v494_v36 = vmul.f32 %v1762_v23, %v474_v28  ;;  %1173 = vrsqrt.f32 %v453_v27 }
 0x1bc   : > { %v1164_v37 = vpop.eup %1163  ;;  %v456_v38 = vadd.f32 1e-05, %v443_v34  ;;  %v455_v39 = vadd.f32 1e-05, %v442_v35 }
 0x1bd   : > { %v1166_v42 = vpop.eup %1165  ;;  %v514_v43 = vadd.f32 %v1768_v31, %v494_v36  ;;  %v476_v17 = vmul.f32 %v1164_v37, %v1709_v18  ;;  %v430_v44 = vpop.xlane.xlu1 %429 }
 0x1be   : > { %v428_v45 = vpop.xlane.xlu0 %427  ;;  %v475_v46 = vmul.f32 %v1166_v42, %v1713_v24  ;;  %1175 = vrsqrt.f32 %v456_v38  ;;  %v445_v47 = vmul.f32 0.0078125, %v430_v44 }
 0x1bf   : > { %v444_v50 = vmul.f32 0.0078125, %v428_v45  ;;  %527 = vst [vmem:[#allocation2] sm:$0xff] %v514_v43  ;;  %v496_v51 = vmul.f32 %v1762_v23, %v476_v17  ;;  %1177 = vrsqrt.f32 %v455_v39 }
 0x1c0   : > { %v1168_v52 = vpop.eup %1167  ;;  %v495_v53 = vmul.f32 %v1762_v23, %v475_v46  ;;  %v458_v54 = vadd.f32 1e-05, %v445_v47 }
 0x1c1   : > { %v457_v55 = vadd.f32 1e-05, %v444_v50  ;;  %v1170_v58 = vpop.eup %1169  ;;  %v516_v59 = vadd.f32 %v1768_v31, %v496_v51  ;;  %v478_v18 = vmul.f32 %v1168_v52, %v1721_v32  ;;  %v434_v60 = vpop.xlane.xlu1 %433 }
 0x1c2   : > { %v432_v61 = vpop.xlane.xlu0 %431  ;;  %v515_v24 = vadd.f32 %v1768_v31, %v495_v53  ;;  %v477_v63 = vmul.f32 %v1170_v58, %v1715_v25  ;;  %1179 = vrsqrt.f32 %v458_v54  ;;  %v447_v0 = vmul.f32 0.0078125, %v434_v60 }
 0x1c3   : > { %529 = vst [vmem:[#allocation2 + $0x10] sm:$0xff] %v516_v59  ;;  %v498_v1 = vmul.f32 %v1762_v23, %v478_v18  ;;  %1181 = vrsqrt.f32 %v457_v55  ;;  %v446_v2 = vmul.f32 0.0078125, %v432_v61 }
 0x1c4   : > { %v1172_v3 = vpop.eup %1171  ;;  %528 = vst [vmem:[#allocation2 + $0x8] sm:$0xff] %v515_v24  ;;  %v497_v4 = vmul.f32 %v1762_v23, %v477_v63  ;;  %v460_v5 = vadd.f32 1e-05, %v447_v0 }
 0x1c5   : > { %v1174_v6 = vpop.eup %1173  ;;  %v518_v32 = vadd.f32 %v1768_v31, %v498_v1  ;;  %v480_v7 = vmul.f32 %v1172_v3, %v1729_v40  ;;  %v459_v8 = vadd.f32 1e-05, %v446_v2 }
 0x1c6   : > { %v517_v25 = vadd.f32 %v1768_v31, %v497_v4  ;;  %v479_v9 = vmul.f32 %v1174_v6, %v1723_v33  ;;  %1183 = vrsqrt.f32 %v460_v5 }
 0x1c7   : > { %531 = vst [vmem:[#allocation2 + $0x20] sm:$0xff] %v518_v32  ;;  %v500_v10 = vmul.f32 %v1762_v23, %v480_v7  ;;  %1185 = vrsqrt.f32 %v459_v8 }
 0x1c8   : > { %v1176_v11 = vpop.eup %1175  ;;  %530 = vst [vmem:[#allocation2 + $0x18] sm:$0xff] %v517_v25  ;;  %v499_v12 = vmul.f32 %v1762_v23, %v479_v9 }
 0x1c9   : > { %v1178_v13 = vpop.eup %1177  ;;  %v520_v14 = vadd.f32 %v1768_v31, %v500_v10  ;;  %v482_v15 = vmul.f32 %v1176_v11, %v1737_v48 }
 0x1ca   : > { %v519_v40 = vadd.f32 %v1768_v31, %v499_v12  ;;  %v481_v16 = vmul.f32 %v1178_v13, %v1731_v41 }
 0x1cb   : > { %533 = vst [vmem:[#allocation2 + $0x30] sm:$0xff] %v520_v14  ;;  %v502_v33 = vmul.f32 %v1762_v23, %v482_v15 }
 0x1cc   : > { %v1180_v19 = vpop.eup %1179  ;;  %532 = vst [vmem:[#allocation2 + $0x28] sm:$0xff] %v519_v40  ;;  %v501_v20 = vmul.f32 %v1762_v23, %v481_v16 }
 0x1cd   : > { %v1182_v21 = vpop.eup %1181  ;;  %v522_v22 = vadd.f32 %v1768_v31, %v502_v33  ;;  %v484_v26 = vmul.f32 %v1180_v19, %v1745_v56 }
 0x1ce   : > { %v521_v27 = vadd.f32 %v1768_v31, %v501_v20  ;;  %v483_v48 = vmul.f32 %v1182_v21, %v1739_v49 }
 0x1cf   : > { %535 = vst [vmem:[#allocation2 + $0x40] sm:$0xff] %v522_v22  ;;  %v504_v28 = vmul.f32 %v1762_v23, %v484_v26 }
 0x1d0   : > { %v1184_v41 = vpop.eup %1183  ;;  %534 = vst [vmem:[#allocation2 + $0x38] sm:$0xff] %v521_v27  ;;  %v503_v29 = vmul.f32 %v1762_v23, %v483_v48 }
 0x1d1   : > { %v1186_v30 = vpop.eup %1185  ;;  %v524_v34 = vadd.f32 %v1768_v31, %v504_v28  ;;  %v486_v35 = vmul.f32 %v1184_v41, %v1753_v62 }
 0x1d2   : > { %v523_v36 = vadd.f32 %v1768_v31, %v503_v29  ;;  %v485_v56 = vmul.f32 %v1186_v30, %v1747_v57 }
 0x1d3   : > { %537 = vst [vmem:[#allocation2 + $0x50] sm:$0xff] %v524_v34  ;;  %v506_v37 = vmul.f32 %v1762_v23, %v486_v35 }
 0x1d4   : > { %536 = vst [vmem:[#allocation2 + $0x48] sm:$0xff] %v523_v36  ;;  %v505_v49 = vmul.f32 %v1762_v23, %v485_v56 }
 0x1d5   : > { %v526_v38 = vadd.f32 %v1768_v31, %v506_v37 }
 0x1d6   : > { %v525_v39 = vadd.f32 %v1768_v31, %v505_v49 }
 0x1d7   : > { %539 = vst [vmem:[#allocation2 + $0x60] sm:$0xff] %v526_v38 }
 0x1d8   : > { %538 = vst [vmem:[#allocation2 + $0x58] sm:$0xff] %v525_v39 }
 0x1d9 PF: > { %v553_v62 = vld [vmem:[%s1674_s20] sm:$0xff]  ;;  %v554_v42 = vld [vmem:[%s1674_s20 + $0x8] sm:$0xff]  ;;  %v555_v57 = vld [vmem:[%s1674_s20 + $0x10] sm:$0xff]  ;;  %v1402_v43 = vmov 0.0|0.0   ;;  %vm1403_vm0 = vmmov 0   ;;  %v1404_v31 = vmov 0.0  }
 0x1da   : > { %986 = vmatprep.subr.bf16.mxu0 %v1402_v43  ;;  %v987_v17 = vpack.c.bf16 %v554_v42, %v553_v62  ;;  %1010 = vmatprep.subr.bf16.mxu1 %v1402_v43  ;;  %v556_v23 = vld [vmem:[%s1674_s20 + $0x18] sm:$0xff]  ;;  %v557_v45 = vld [vmem:[%s1674_s20 + $0x20] sm:$0xff]  ;;  %v558_v46 = vld [vmem:[%s1674_s20 + $0x28] sm:$0xff]  ;;  %s1870_s0 = scalar_lea.sflag [#allocation5], %s310_s14  ;;  %p2004_p0 = scmp.ne.s32.totalorder %s1999_s11, 0 }
 0x1db   : > { %947 = vmatprep.mubr.msk.f32.mxu0 %vm1403_vm0, %v1404_v31  ;;  %968 = vmatprep.mubr.msk.f32.mxu1 %vm1403_vm0, %v1404_v31  ;;  %v990_v44 = vpack.c.bf16 %v556_v23, %v555_v57  ;;  %v993_v47 = vpack.c.bf16 %v558_v46, %v557_v45  ;;  %v559_v50 = vld [vmem:[%s1674_s20 + $0x30] sm:$0xff]  ;;  %v560_v51 = vld [vmem:[%s1674_s20 + $0x38] sm:$0xff]  ;;  %v561_v53 = vld [vmem:[%s1674_s20 + $0x40] sm:$0xff]  ;;  %s2005_s7 = sld [smem:[#allocation14_spill]] (%p2004_p0) }
 0x1dc   : > { %988 = vmatpush3.bf16.msra.mxu0 %v987_v17  ;;  %1018 = vmatpush3.bf16.msra.mxu1 %v987_v17  ;;  %v996_v52 = vpack.c.bf16 %v560_v51, %v559_v50  ;;  %v562_v54 = vld [vmem:[%s1674_s20 + $0x48] sm:$0xff]  ;;  %v563_v58 = vld [vmem:[%s1674_s20 + $0x50] sm:$0xff]  ;;  %v564_v59 = vld [vmem:[%s1674_s20 + $0x58] sm:$0xff] }
 0x1dd   : > { %989 = vmatprep.subr.bf16.mxu0 %v1402_v43  ;;  %1011 = vmatprep.subr.bf16.mxu1 %v1402_v43  ;;  %v999_v55 = vpack.c.bf16 %v562_v54, %v561_v53  ;;  %v1002_v18 = vpack.c.bf16 %v564_v59, %v563_v58  ;;  %v565_v60 = vld [vmem:[%s1674_s20 + $0x60] sm:$0xff]  ;;  %v566_v61 = vld [vmem:[%s1674_s20 + $0x68] sm:$0xff]  ;;  %v567_v63 = vld [vmem:[%s1674_s20 + $0x70] sm:$0xff] }
 0x1de   : > { %v1005_v24 = vpack.c.bf16 %v566_v61, %v565_v60  ;;  %v568_v0 = vld [vmem:[%s1674_s20 + $0x78] sm:$0xff]  ;;  %v540_v2 = vld [vmem:[#allocation2] sm:$0xff]  ;;  %v547_v3 = vld [vmem:[#allocation2 + $0x38] sm:$0xff] }
 0x1df   : > { %v1008_v1 = vpack.c.bf16 %v568_v0, %v567_v63  ;;  %v541_v4 = vld [vmem:[#allocation2 + $0x8] sm:$0xff]  ;;  %v548_v5 = vld [vmem:[#allocation2 + $0x40] sm:$0xff]  ;;  %v542_v6 = vld [vmem:[#allocation2 + $0x10] sm:$0xff] }
 0x1e0   : > { %991 = vmatpush3.bf16.msra.mxu0 %v990_v44  ;;  %1019 = vmatpush3.bf16.msra.mxu1 %v990_v44  ;;  %v549_v32 = vld [vmem:[#allocation2 + $0x48] sm:$0xff]  ;;  %v543_v7 = vld [vmem:[#allocation2 + $0x18] sm:$0xff]  ;;  %v550_v8 = vld [vmem:[#allocation2 + $0x50] sm:$0xff] }
 0x1e1   : > { %992 = vmatprep.subr.bf16.mxu0 %v1402_v43  ;;  %1012 = vmatprep.subr.bf16.mxu1 %v1402_v43  ;;  %v544_v25 = vld [vmem:[#allocation2 + $0x20] sm:$0xff]  ;;  %v551_v9 = vld [vmem:[#allocation2 + $0x58] sm:$0xff]  ;;  %v545_v10 = vld [vmem:[#allocation2 + $0x28] sm:$0xff]  ;;  %s727_s28 = smul.u32 (%p2004_p0), 13, %s2005_s7 }
 0x1e2   : > { %v552_v11 = vld [vmem:[#allocation2 + $0x60] sm:$0xff]  ;;  %v546_v12 = vld [vmem:[#allocation2 + $0x30] sm:$0xff] }
 0x1e3   : > { %v875_v13 = vld [vmem:[%s320_s30] ss:$0 sm:$0xff]  ;;  %s728_s20 = ssub.s32 (%p2004_p0), 50, %s727_s28 }
 0x1e4   : > { %994 = vmatpush3.bf16.msra.mxu0 %v993_v47  ;;  %1020 = vmatpush3.bf16.msra.mxu1 %v993_v47  ;;  %p729_p4 = scmp.lt.s32.totalorder (%p2004_p0), %s728_s20, 13 }
 0x1e5   : > { %995 = vmatprep.subr.bf16.mxu0 %v1402_v43  ;;  %1013 = vmatprep.subr.bf16.mxu1 %v1402_v43 }
 0x1e8   : > { %997 = vmatpush3.bf16.msra.mxu0 %v996_v52  ;;  %1021 = vmatpush3.bf16.msra.mxu1 %v996_v52 }
 0x1e9   : > { %998 = vmatprep.subr.bf16.mxu0 %v1402_v43  ;;  %1014 = vmatprep.subr.bf16.mxu1 %v1402_v43 }
 0x1ec   : > { %1000 = vmatpush3.bf16.msra.mxu0 %v999_v55  ;;  %1022 = vmatpush3.bf16.msra.mxu1 %v999_v55 }
 0x1ed   : > { %1001 = vmatprep.subr.bf16.mxu0 %v1402_v43  ;;  %1015 = vmatprep.subr.bf16.mxu1 %v1402_v43 }
 0x1f0   : > { %1003 = vmatpush3.bf16.msra.mxu0 %v1002_v18  ;;  %1023 = vmatpush3.bf16.msra.mxu1 %v1002_v18 }
 0x1f1   : > { %1004 = vmatprep.subr.bf16.mxu0 %v1402_v43  ;;  %1016 = vmatprep.subr.bf16.mxu1 %v1402_v43 }
 0x1f4   : > { %1006 = vmatpush3.bf16.msra.mxu0 %v1005_v24  ;;  %1024 = vmatpush3.bf16.msra.mxu1 %v1005_v24 }
 0x1f5   : > { %1007 = vmatprep.subr.bf16.mxu0 %v1402_v43  ;;  %1017 = vmatprep.subr.bf16.mxu1 %v1402_v43 }
 0x1f8   : > { %1009 = vmatpush3.bf16.msra.mxu0 %v1008_v1  ;;  %1025 = vmatpush3.bf16.msra.mxu1 %v1008_v1 }
 0x1fb   : > { %948 = vmatmul.mubr.f32.vlgmr.msra.gmra.mrb[0].mxu0 %v540_v2  ;;  %969 = vmatmul.mubr.f32.vlgmr.msra.gmra.mrb[0].mxu1 %v547_v3 }
 0x1fc   : > { %950 = vmatprep.mubr.msk.f32.mxu0 %vm1403_vm0, %v1404_v31  ;;  %971 = vmatprep.mubr.msk.f32.mxu1 %vm1403_vm0, %v1404_v31 }
 0x1ff   : > { %951 = vmatmul.mubr.f32.gmra.mrb[2].mxu0 %v541_v4  ;;  %972 = vmatmul.mubr.f32.gmra.mrb[2].mxu1 %v548_v5 }
 0x200   : > { %953 = vmatprep.mubr.msk.f32.mxu0 %vm1403_vm0, %v1404_v31  ;;  %974 = vmatprep.mubr.msk.f32.mxu1 %vm1403_vm0, %v1404_v31 }
 0x203   : > { %954 = vmatmul.mubr.f32.gmra.mrb[4].mxu0 %v542_v6  ;;  %975 = vmatmul.mubr.f32.gmra.mrb[4].mxu1 %v549_v32 }
 0x204   : > { %956 = vmatprep.mubr.msk.f32.mxu0 %vm1403_vm0, %v1404_v31  ;;  %977 = vmatprep.mubr.msk.f32.mxu1 %vm1403_vm0, %v1404_v31 }
 0x207   : > { %957 = vmatmul.mubr.f32.gmra.mrb[6].mxu0 %v543_v7  ;;  %978 = vmatmul.mubr.f32.gmra.mrb[6].mxu1 %v550_v8 }
 0x208   : > { %959 = vmatprep.mubr.msk.f32.mxu0 %vm1403_vm0, %v1404_v31  ;;  %980 = vmatprep.mubr.msk.f32.mxu1 %vm1403_vm0, %v1404_v31 }
 0x20b   : > { %960 = vmatmul.mubr.f32.gmra.mrb[8].mxu0 %v544_v25  ;;  %981 = vmatmul.mubr.f32.gmra.mrb[8].mxu1 %v551_v9 }
 0x20c   : > { %962 = vmatprep.mubr.msk.f32.mxu0 %vm1403_vm0, %v1404_v31  ;;  %983 = vmatprep.mubr.msk.f32.mxu1 %vm1403_vm0, %v1404_v31 }
 0x20f   : > { %963 = vmatmul.mubr.f32.gmra.mrb[10].mxu0 %v545_v10  ;;  %984 = vmatmul.mubr.f32.gmra.mrb[10].mxu1 %v552_v11 }
 0x210   : > { %965 = vmatprep.mubr.msk.f32.mxu0 %vm1403_vm0, %v1404_v31 }
 0x213   : > { %966 = vmatmul.mubr.f32.gmra.mrb[12].mxu0 %v546_v12 }
 0x2ce   : > { %v642_v14 = vpop.f32.mrb[0].mxu0  ;;  %v677_v15 = vpop.f32.mrb[0].mxu1 }
 0x2cf   : > { %v643_v40 = vadd.f32 %v875_v13, %v642_v14  ;;  %v949_v16 = vpop.f32.mrb[1].mxu0  ;;  %v678_v33 = vadd.f32 %v875_v13, %v677_v15  ;;  %v970_v19 = vpop.f32.mrb[1].mxu1 }
 0x2d1   : > { %706 = vst [vmem:[%s1691_s26] sm:$0xff] %v643_v40  ;;  %713 = vst [vmem:[%s1691_s26 + $0x38] sm:$0xff] %v678_v33 }
 0x2d2   : > { %v647_v20 = vpop.f32.mrb[2].mxu0  ;;  %v682_v21 = vpop.f32.mrb[2].mxu1 }
 0x2d3   : > { %v648_v22 = vadd.f32 %v875_v13, %v647_v20  ;;  %v952_v26 = vpop.f32.mrb[3].mxu0  ;;  %v683_v27 = vadd.f32 %v875_v13, %v682_v21  ;;  %v973_v48 = vpop.f32.mrb[3].mxu1 }
 0x2d5   : > { %707 = vst [vmem:[%s1691_s26 + $0x8] sm:$0xff] %v648_v22  ;;  %714 = vst [vmem:[%s1691_s26 + $0x40] sm:$0xff] %v683_v27 }
 0x2d6   : > { %v652_v28 = vpop.f32.mrb[4].mxu0  ;;  %v687_v41 = vpop.f32.mrb[4].mxu1 }
 0x2d7   : > { %v653_v29 = vadd.f32 %v875_v13, %v652_v28  ;;  %v955_v30 = vpop.f32.mrb[5].mxu0  ;;  %v688_v34 = vadd.f32 %v875_v13, %v687_v41  ;;  %v976_v35 = vpop.f32.mrb[5].mxu1 }
 0x2d9   : > { %708 = vst [vmem:[%s1691_s26 + $0x10] sm:$0xff] %v653_v29  ;;  %715 = vst [vmem:[%s1691_s26 + $0x48] sm:$0xff] %v688_v34 }
 0x2da   : > { %v657_v36 = vpop.f32.mrb[6].mxu0  ;;  %v692_v56 = vpop.f32.mrb[6].mxu1 }
 0x2db   : > { %v658_v37 = vadd.f32 %v875_v13, %v657_v36  ;;  %v958_v49 = vpop.f32.mrb[7].mxu0  ;;  %v693_v38 = vadd.f32 %v875_v13, %v692_v56  ;;  %v979_v39 = vpop.f32.mrb[7].mxu1 }
 0x2dd   : > { %709 = vst [vmem:[%s1691_s26 + $0x18] sm:$0xff] %v658_v37  ;;  %716 = vst [vmem:[%s1691_s26 + $0x50] sm:$0xff] %v693_v38 }
 0x2de   : > { %v662_v62 = vpop.f32.mrb[8].mxu0  ;;  %v697_v42 = vpop.f32.mrb[8].mxu1 }
 0x2df   : > { %v663_v57 = vadd.f32 %v875_v13, %v662_v62  ;;  %v961_v43 = vpop.f32.mrb[9].mxu0  ;;  %v698_v17 = vadd.f32 %v875_v13, %v697_v42  ;;  %v982_v23 = vpop.f32.mrb[9].mxu1 }
 0x2e1   : > { %710 = vst [vmem:[%s1691_s26 + $0x20] sm:$0xff] %v663_v57  ;;  %717 = vst [vmem:[%s1691_s26 + $0x58] sm:$0xff] %v698_v17 }
 0x2e2   : > { %v667_v31 = vpop.f32.mrb[10].mxu0  ;;  %v702_v44 = vpop.f32.mrb[10].mxu1 }
 0x2e3   : > { %v668_v45 = vadd.f32 %v875_v13, %v667_v31  ;;  %v964_v46 = vpop.f32.mrb[11].mxu0  ;;  %v703_v47 = vadd.f32 %v875_v13, %v702_v44  ;;  %v985_v50 = vpop.f32.mrb[11].mxu1  ;;  %726 = sbr.rel (!%p2004_p0) target bundleno = 778 (0x30a), region = 56 }
 0x2e5   : > { %711 = vst [vmem:[%s1691_s26 + $0x28] sm:$0xff] %v668_v45  ;;  %718 = vst [vmem:[%s1691_s26 + $0x60] sm:$0xff] %v703_v47 }
 0x2e6   : > { %v672_v51 = vpop.f32.mrb[12].mxu0 }
 0x2e7   : > { %v673_v52 = vadd.f32 %v875_v13, %v672_v51  ;;  %v967_v53 = vpop.f32.mrb[13].mxu0 }
 0x2e9   : > { %712 = vst [vmem:[%s1691_s26 + $0x30] sm:$0xff] %v673_v52 }
 0x2ea   : > { %s2035_s20 = smov (!%p729_p4, %s728_s20), 13 }
 0x2eb   : > { %s1875_s16 = sshll.u32 %s2035_s20, 7 }
 0x2ec   : > { %s733_s15 = ssub.s32 1664, %s1875_s16 }
 0x2ed   : > { %734 = vsyncadd %s1870_s0, %s733_s15  ;;  %p877_p5 = scmp.ne.s32.totalorder %s1875_s16, 0  ;;  %s885_s11 = smul.u32 26, %s2005_s7 }
 0x2ee   : > { %s741_s14 = sshll.u32 %s1691_s26, 4  ;;  %s2006_s8 = sld [smem:[#allocation22_spill]]  ;;  %s1883_s14 = int_to_ptr.vmem [resolvable:$true] %s741_s14 }
 0x2ef   : > { %s737_s21 = sadd.s32 %s1377_s27, %s885_s11  ;;  %s1243_s5 = scalar_lea.vmem %s1883_s14, %s1875_s16 }
 0x2f0   : > { %s879_s12 = sshll.u32 %s737_s21, 7  ;;  %p1244_p2 = scmp.ne.s32.totalorder %s1883_s14, %s1243_s5 }
 0x2f1   : > { %s1405_s10 = smov [#allocation8]  }
 0x2f2   : > { %p1245_p13 = pnand %p1244_p2, %p877_p5  ;;  %s1247_s24 = sshll.u32 %s1405_s10, 4  ;;  %s1248_s24 = int_to_ptr.vmem [resolvable:$false] %s1247_s24 }
 0x2f3   : > { %s1249_s27 = scalar_lea.vmem %s1248_s24, 3328  ;;  %p1250_p3 = scmp.lt.s32.totalorder %s1883_s14, %s1248_s24 }
 0x2f4   : > { %s1888_s17 = scalar_lea.hbm %s2006_s8, %s879_s12  ;;  %p1246_p8 = pneg %p1245_p13 }
 0x2f5   : > { %p1251_p1 = scmp.lt.s32.totalorder %s1249_s27, %s1243_s5 }
 0x2f7   : > { %p1252_p9 = por %p1251_p1, %p1250_p3 }
 0x2f9   : > { %p1253_p6 = pnand %p1252_p9, %p1246_p8 }
 0x2fb   : > { %1256 = shalt.err (!%p1253_p6)
}
 0x2fc   : > { %s1257_s26 = scalar_lea.hbm %s1888_s17, %s1875_s16  ;;  %s1261_s20 = scalar_lea.hbm %s2006_s8, 12800 }
 0x2fd   : > { %p1258_p10 = scmp.ne.s32.totalorder %s1888_s17, %s1257_s26  ;;  %p1262_p7 = scmp.lt.u32.totalorder %s1888_s17, %s2006_s8 }
 0x2fe   : > { %p1263_p0 = scmp.lt.u32.totalorder %s1261_s20, %s1257_s26  ;;  %p1265_p2 = scmp.lt.u32.totalorder %s1257_s26, %s1888_s17 }
 0x2ff   : > { %p1259_p12 = pnand %p1258_p10, %p877_p5 }
 0x300   : > { %p1264_p4 = por %p1263_p0, %p1262_p7 }
 0x301   : > { %p1260_p11 = pneg %p1259_p12 }
 0x302   : > { %p1266_p13 = por %p1265_p2, %p1264_p4 }
 0x304   : > { %p1267_p8 = pnand %p1266_p13, %p1260_p11 }
 0x306   : > { %1270 = shalt.err (!%p1267_p8)
}
 0x307   : > { %s1406_s21 = smov 128   ;;  %s1407_s12 = smov 256  }
 0x308   : > { %s1408_s30 = smov 8  }
 0x309   : > { %747 = dma.vmem_to_hbm [thread:$0]  (%p877_p5), %s1883_s14, %s1875_s16, %s1888_s17, %s1870_s0, %s1406_s21, %s1407_s12, %s1408_s30  }
 0x30a PF: > { %p1037_p3 = scmp.ge.s32.totalorder %s1393_s6, 2  ;;  %s756_s9 = sand.u32 1, %s1341_s18  }
 0x30b   : > { %p2007_p1 = scmp.ne.s32.totalorder %s2001_s13, 0  ;;  %s757_s5 = scalar_lea.sflag [#allocation5], %s756_s9 }
 0x30d   : > { %p1034_p9 = pnand %p1037_p3, %p2007_p1 }
 0x30f   : > { %1336 = dma.done.wait (!%p1034_p9), %s757_s5, 1664  }
 0x310   : > { %1338 = vsyncadd (!%p1034_p9), %s757_s5, 4294965632  ;;  %s24_s6 = sadd.s32 1, %s1393_s6   ;;  %s2009_s0 = sld [smem:[#allocation12_spill]] }
 0x311   : > { %p1920_p6 = scmp.ge.s32.totalorder %s24_s6, 10   ;;  %s2010_s20 = sld [smem:[#allocation20_spill]] }
 0x312   : > { %s2011_s16 = sld [smem:[#allocation18_spill]]  ;;  %s2012_s14 = sld [smem:[#allocation13_spill]] }
 0x313   : > { %s2013_s26 = sld [smem:[#allocation19_spill]]  ;;  %s2014_s28 = sld [smem:[#allocation15_spill]] }
 0x314   : > { %s2015_s13 = sld [smem:[#allocation16_spill]]  ;;  %s2016_s30 = sld [smem:[#allocation17_spill]] }
 0x315   : > { %s2017_s18 = smov %s1345_s19  ;;  %s2019_s21 = smov %s1357_s22 }
 0x316   : > { %s2018_s19 = smov %s2009_s0  ;;  %s2020_s22 = smov %s1361_s23 }
 0x317   : > { %s2022_s24 = smov %s1369_s25  ;;  %s2024_s27 = smov %s1385_s29 }
 0x318   : > { %s2021_s23 = smov %s2011_s16  ;;  %s2023_s25 = smov %s2012_s14 }
 0x319   :  { %23 = sbr.rel (!%p1920_p6) target bundleno = 15 (0xf), region = 105 }
 0x31a   : > { %s2025_s29 = smov %s2015_s13 }
 0x320   :  { %762 = vsyncpa [#allocation4], 1 }
 0x321   :  { %764 = vsyncpa [#allocation4 + $0x1], 1 }
 0x322   :  { %765 = vsyncpa [#allocation7], 1 }
 0x323   :  { %767 = vsyncpa [#allocation7 + $0x1], 1 }
 0x324   :  { %768 = vsyncpa [#allocation5], 1 }
 0x325   :  { %770 = vsyncpa [#allocation5 + $0x1], 1 }

</bundles_post_ra>
